<compile_context>
chip_gen: v7x
topology: tpu7x:2x2x1
jax: 0.10.0
libtpu: 0.0.40
codegen_flags: <defaults>
</compile_context>

<pallas_src>
import functools
import math

import jax
import jax.numpy as jnp
from jax.experimental import pallas as pl
from jax.experimental.pallas import tpu as pltpu


def _expert_head_kernel(x_ref, w_ref, b_ref, out_ref, acc_ref, *,
                        inv_seq_len, valid_rows, ragged):
    """One (batch-tile, sequence-tile) grid step.

    x_ref:   (TB, TS, Hr) folded embedding tile (any float dtype)
    w_ref:   (1, Hr)      folded probe weight, lane-dense
    b_ref:   (1, 1)       probe bias (SMEM scalar)
    out_ref: (TB, 2)      [:, 0] = prediction (0./1.), [:, 1] = confidence
    acc_ref: (TB, Hr)     f32 running sequence-sum accumulator (VMEM scratch)
    """
    j = pl.program_id(1)

    @pl.when(j == 0)
    def _init():
        acc_ref[...] = jnp.zeros_like(acc_ref)

    x = x_ref[...]
    if ragged:
        # Tail tile of a non-divisible sequence grid: rows past `valid_rows`
        # hold unspecified data -- select them to zero before accumulating.
        ts = x_ref.shape[1]
        pos = j * ts + jax.lax.broadcasted_iota(jnp.int32, x_ref.shape, 1)
        x = jnp.where(pos < valid_rows, x, jnp.zeros_like(x))

    # Accumulate the sequence sum in f32 (bf16 tiles stay packed in vregs).
    acc_ref[...] += jnp.sum(x, axis=1, dtype=jnp.float32)

    # Epilogue only on the last sequence tile: probe, sigmoid, one store.
    @pl.when(j == pl.num_programs(1) - 1)
    def _finalize():
        # Fold the 1/S mean scale into the (1, Hr) probe weight (one vreg op)
        # rather than scaling the (TB, Hr) accumulator.
        w = w_ref[...].astype(jnp.float32) * inv_seq_len
        logits = jnp.sum(acc_ref[...] * w, axis=-1, keepdims=True) + b_ref[0, 0]
        conf = jax.nn.sigmoid(logits)
        pred = (conf > 0.5).astype(jnp.float32)
        out_ref[...] = jnp.concatenate([pred, conf], axis=-1)


def _vmem_capacity_bytes():
    """Detected per-core VMEM capacity; conservative 64 MiB (v7x) fallback."""
    cap = 64 * 1024 * 1024
    try:
        info_fn = getattr(pltpu, "get_tpu_info", None)
        if info_fn is not None:
            cap = int(info_fn().vmem_capacity_bytes)
    except Exception:
        pass
    return cap


def _fold_factor(S, H):
    """Sequence positions folded per row so the hidden axis spans full 128-lane
    vregs.  Returns 1 when H is already a multiple of 128 or folding is not
    possible (S not divisible by the required factor)."""
    if H % 128 == 0:
        return 1
    r = math.lcm(H, 128) // H
    if r <= S and S % r == 0:
        return r
    return 1


def _pick_tiles(B, S2, Hr, itemsize, tb=None, ts=None):
    """Tile sizes respecting the (8, 128)/full-dim rule, dtype-aware sublane
    packing, a ~8 MiB x-tile budget (double/triple-buffered it still fits the
    vmem limit on every generation), and >= 2 batch grid steps when B allows
    (so both v7x TensorCores get parallel work)."""
    if tb is None:
        tb = 8 if (B % 8 == 0 and B >= 16) else B
    if ts is None:
        m = 8 * max(1, 4 // itemsize)   # sublane multiple: 8/16/32 for 4/2/1-byte
        budget = 8 * 1024 * 1024
        cap = budget // max(1, tb * Hr * itemsize)
        cap = max(m, (cap // m) * m)
        ts = S2 if S2 <= cap else cap
    return tb, ts


def task_expert_forward(x, w, b, *, tb=None, ts=None):
    """x: (B, S, H) embeddings, w: (1, H), b: (1, 1) -> (B, 2) [pred, conf].

    `ts` (optional) is the sequence tile size in *folded* rows (S // fold).
    """
    B, S, H = x.shape
    assert w.shape == (1, H) and b.shape == (1, 1)

    # Lane-dense layout: fold r consecutive sequence positions into the hidden
    # axis so the last BlockSpec dim is a 128-lane multiple (free reshape).
    r = _fold_factor(S, H)
    Hr = H * r
    S2 = S // r
    x2 = x.reshape(B, S2, Hr) if r > 1 else x
    w2 = jnp.tile(w, (1, r)) if r > 1 else w

    TB, TS = _pick_tiles(B, S2, Hr, x.dtype.itemsize, tb, ts)
    assert B % TB == 0, (B, TB)
    n_seq = pl.cdiv(S2, TS)
    ragged = (S2 % TS) != 0

    kernel = functools.partial(
        _expert_head_kernel,
        inv_seq_len=1.0 / float(S),
        valid_rows=S2,
        ragged=ragged,
    )

    vmem_cap = _vmem_capacity_bytes()

    x_index_map = lambda i, j: (i, j, 0)
    x_spec = pl.BlockSpec((TB, TS, Hr), x_index_map)
    # Spend spare VMEM (v5e/v6e: 128 MiB) on pipeline depth, not bigger tiles.
    if vmem_cap >= 100 * 1024 * 1024 and n_seq >= 4:
        try:
            x_spec = pl.BlockSpec((TB, TS, Hr), x_index_map,
                                  pipeline_mode=pl.Buffered(3))
        except (TypeError, AttributeError):
            pass

    return pl.pallas_call(
        kernel,
        out_shape=jax.ShapeDtypeStruct((B, 2), jnp.float32),
        grid=(B // TB, n_seq),
        in_specs=[
            x_spec,
            pl.BlockSpec((1, Hr), lambda i, j: (0, 0)),
            pl.BlockSpec(memory_space=pltpu.MemorySpace.SMEM),
        ],
        out_specs=pl.BlockSpec((TB, 2), lambda i, j: (i, 0)),
        scratch_shapes=[pltpu.VMEM((TB, Hr), jnp.float32)],
        compiler_params=pltpu.CompilerParams(
            dimension_semantics=("parallel", "arbitrary"),
            # ~75% of physical per-core VMEM: 48 MiB on v7x, 96 MiB on v5e/v6e.
            vmem_limit_bytes=(vmem_cap * 3) // 4,
        ),
    )(x2, w2, b)


def reference_forward(x, w, b):
    pooled = jnp.mean(x.astype(jnp.float32), axis=1)                   # (B, H)
    logits = jnp.sum(pooled * w.astype(jnp.float32), axis=-1, keepdims=True)
    logits = logits + b[0, 0]
    conf = jax.nn.sigmoid(logits)
    pred = (conf > 0.5).astype(jnp.float32)
    return jnp.concatenate([pred, conf], axis=-1)


if __name__ == "__main__":
    key = jax.random.PRNGKey(0)
    kx, kw, kb = jax.random.split(key, 3)

    # Small shapes: batch=2, seq=72, hidden=32.  H=32 exercises the lane-dense
    # folding (r=4 -> folded rows of 128 lanes, 18 folded rows per example).
    B, S, H = 2, 72, 32
    x = jax.random.normal(kx, (B, S, H), dtype=jnp.float32)

    # Deterministic synthetic parameters for the shallow expert head
    # (stands in for the torch.load'ed shallow_model; not a checkpoint load).
    w = jax.random.normal(kw, (1, H), dtype=jnp.float32) * 0.1
    b = jax.random.normal(kb, (1, 1), dtype=jnp.float32) * 0.1

    ref = jax.block_until_ready(reference_forward(x, w, b))

    # 1) ts=8 folded rows -> 3 sequence grid steps with a ragged (2-row) tail:
    #    exercises the accumulator init/finalize and the iota mask path.
    out = jax.block_until_ready(task_expert_forward(x, w, b, ts=8))
    assert out.shape == (B, 2)
    assert jnp.allclose(out, ref, atol=1e-5, rtol=1e-5), (out, ref)

    # 2) Default auto tiling (single sequence step).
    out_auto = jax.block_until_ready(task_expert_forward(x, w, b))
    assert jnp.allclose(out_auto, ref, atol=1e-5, rtol=1e-5), (out_auto, ref)

    # 3) bf16 streaming (f32 accumulation in-kernel): confidence only, within
    #    bf16 tolerance (prediction threshold can legitimately flip near 0.5).
    out_bf16 = jax.block_until_ready(
        task_expert_forward(x.astype(jnp.bfloat16), w, b, ts=16))
    assert jnp.allclose(out_bf16[:, 1], ref[:, 1], atol=5e-2), (out_bf16, ref)

    print("KERNEL_OK")
</pallas_src>

<mosaic_0001>
module attributes {stable_mosaic.version = 11 : i64} {
  func.func @_expert_head_kernel(%arg0: i32, %arg1: i32, %arg2: memref<2x8x128xf32, #tpu.memory_space<vmem>>, %arg3: memref<1x128xf32, #tpu.memory_space<vmem>>, %arg4: memref<1x1xf32, #tpu.memory_space<smem>>, %arg5: memref<2x2xf32, #tpu.memory_space<vmem>>, %arg6: memref<2x128xf32, #tpu.memory_space<vmem>>) attributes {dimension_semantics = [#tpu.dimension_semantics<parallel>, #tpu.dimension_semantics<arbitrary>], iteration_bounds = array<i64: 1, 3>, scalar_prefetch = 0 : i64, scratch_operands = 1 : i64, tpu.core_type = #tpu.core_type<tc>, window_params = [{transform_indices = @transform_0, window_bounds = array<i64: 2, 8, 128>}, {pipeline_mode = #tpu.pipeline_mode<synchronous>, transform_indices = @transform_1, window_bounds = array<i64: 1, 128>}, {transform_indices = @transform_2, window_bounds = array<i64: 1, 1>}, {transform_indices = @transform_3, window_bounds = array<i64: 2, 2>}]} {
    %c0_i32 = arith.constant 0 : i32
    %0 = arith.cmpi eq, %arg1, %c0_i32 : i32
    %1 = arith.extui %0 : i1 to i32
    %c0_i32_0 = arith.constant 0 : i32
    %2 = arith.cmpi ne, %1, %c0_i32_0 : i32
    scf.if %2 {
      %cst_9 = arith.constant 0.000000e+00 : f32
      %19 = vector.broadcast %cst_9 : f32 to vector<2x128xf32>
      %c0_10 = arith.constant 0 : index
      %c0_11 = arith.constant 0 : index
      %20 = vector.load %arg6[%c0_10, %c0_11] : memref<2x128xf32, #tpu.memory_space<vmem>>, vector<2x128xf32>
      tpu.vector_store %arg6[%c0_10, %c0_11], %19 {strides = array<i32>} : memref<2x128xf32, #tpu.memory_space<vmem>>, vector<2x128xf32>,
    } else {
    }
    %c0 = arith.constant 0 : index
    %c0_1 = arith.constant 0 : index
    %c0_2 = arith.constant 0 : index
    %3 = vector.load %arg2[%c0, %c0_1, %c0_2] : memref<2x8x128xf32, #tpu.memory_space<vmem>>, vector<2x8x128xf32>
    %c8_i32 = arith.constant 8 : i32
    %4 = arith.muli %arg1, %c8_i32 : i32
    %5 = tpu.iota {dimensions = array<i32: 1>} : vector<2x8x128xi32>
    %6 = vector.broadcast %4 : i32 to vector<2x8x128xi32>
    %7 = arith.addi %6, %5 : vector<2x8x128xi32>
    %c18_i32 = arith.constant 18 : i32
    %8 = vector.broadcast %c18_i32 : i32 to vector<2x8x128xi32>
    %9 = arith.cmpi slt, %7, %8 : vector<2x8x128xi32>
    %cst = arith.constant 0.000000e+00 : f32
    %10 = vector.broadcast %cst : f32 to vector<2x8x128xf32>
    %11 = arith.select %9, %3, %10 : vector<2x8x128xi1>, vector<2x8x128xf32>
    %c0_3 = arith.constant 0 : index
    %c0_4 = arith.constant 0 : index
    %12 = vector.load %arg6[%c0_3, %c0_4] : memref<2x128xf32, #tpu.memory_space<vmem>>, vector<2x128xf32>
    %cst_5 = arith.constant dense<0.000000e+00> : vector<2x128xf32>
    %13 = vector.multi_reduction <add>, %11, %cst_5 [1] : vector<2x8x128xf32> to vector<2x128xf32>
    %14 = arith.addf %12, %13 : vector<2x128xf32>
    %c0_6 = arith.constant 0 : index
    %c0_7 = arith.constant 0 : index
    %15 = vector.load %arg6[%c0_6, %c0_7] : memref<2x128xf32, #tpu.memory_space<vmem>>, vector<2x128xf32>
    tpu.vector_store %arg6[%c0_6, %c0_7], %14 {strides = array<i32>} : memref<2x128xf32, #tpu.memory_space<vmem>>, vector<2x128xf32>,
    %c2_i32 = arith.constant 2 : i32
    %16 = arith.cmpi eq, %arg1, %c2_i32 : i32
    %17 = arith.extui %16 : i1 to i32
    %c0_i32_8 = arith.constant 0 : i32
    %18 = arith.cmpi ne, %17, %c0_i32_8 : i32
    scf.if %18 {
      %c0_9 = arith.constant 0 : index
      %c0_10 = arith.constant 0 : index
      %19 = vector.load %arg3[%c0_9, %c0_10] : memref<1x128xf32, #tpu.memory_space<vmem>>, vector<1x128xf32>
      %cst_11 = arith.constant 0.013888889 : f32
      %20 = vector.broadcast %cst_11 : f32 to vector<1x128xf32>
      %21 = arith.mulf %19, %20 : vector<1x128xf32>
      %c0_12 = arith.constant 0 : index
      %c0_13 = arith.constant 0 : index
      %22 = vector.load %arg6[%c0_12, %c0_13] : memref<2x128xf32, #tpu.memory_space<vmem>>, vector<2x128xf32>
      %23 = vector.broadcast %21 : vector<1x128xf32> to vector<2x128xf32>
      %24 = arith.mulf %22, %23 : vector<2x128xf32>
      %cst_14 = arith.constant dense<0.000000e+00> : vector<2xf32>
      %25 = vector.multi_reduction <add>, %24, %cst_14 [1] : vector<2x128xf32> to vector<2xf32>
      %26 = vector.shape_cast %25 : vector<2xf32> to vector<2x1xf32>
      %c0_15 = arith.constant 0 : index
      %c0_16 = arith.constant 0 : index
      %27 = memref.load %arg4[%c0_15, %c0_16] : memref<1x1xf32, #tpu.memory_space<smem>>
      %28 = vector.broadcast %27 : f32 to vector<2x1xf32>
      %29 = arith.addf %26, %28 : vector<2x1xf32>
      %30 = arith.negf %29 : vector<2x1xf32>
      %31 = math.exp %30 : vector<2x1xf32>
      %cst_17 = arith.constant 1.000000e+00 : f32
      %32 = vector.broadcast %cst_17 : f32 to vector<2x1xf32>
      %33 = arith.addf %32, %31 : vector<2x1xf32>
      %34 = arith.divf %32, %33 : vector<2x1xf32>
      %cst_18 = arith.constant 5.000000e-01 : f32
      %35 = vector.broadcast %cst_18 : f32 to vector<2x1xf32>
      %36 = arith.cmpf ogt, %34, %35 : vector<2x1xf32>
      %37 = arith.extui %36 : vector<2x1xi1> to vector<2x1xi32>
      %38 = arith.sitofp %37 : vector<2x1xi32> to vector<2x1xf32>
      %39 = tpu.concatenate %38, %34 in 1 : vector<2x1xf32>, vector<2x1xf32> -> vector<2x2xf32>
      %c0_19 = arith.constant 0 : index
      %c0_20 = arith.constant 0 : index
      %40 = vector.load %arg5[%c0_19, %c0_20] : memref<2x2xf32, #tpu.memory_space<vmem>>, vector<2x2xf32>
      tpu.vector_store %arg5[%c0_19, %c0_20], %39 {strides = array<i32>} : memref<2x2xf32, #tpu.memory_space<vmem>>, vector<2x2xf32>,
    } else {
    }
    return
  }
  func.func @transform_0(%arg0: i32, %arg1: i32) -> (i32, i32, i32) {
    %c0_i32 = arith.constant 0 : i32
    %c0_i32_0 = arith.constant 0 : i32
    return %arg0, %arg1, %c0_i32 : i32, i32, i32
  }
  func.func @transform_1(%arg0: i32, %arg1: i32) -> (i32, i32) {
    %c0_i32 = arith.constant 0 : i32
    %c0_i32_0 = arith.constant 0 : i32
    %c0_i32_1 = arith.constant 0 : i32
    return %c0_i32, %c0_i32_0 : i32, i32
  }
  func.func @transform_2(%arg0: i32, %arg1: i32) -> (i32, i32) {
    %c0_i32 = arith.constant 0 : i32
    %c0_i32_0 = arith.constant 0 : i32
    %c0_i32_1 = arith.constant 0 : i32
    return %c0_i32, %c0_i32_0 : i32, i32
  }
  func.func @transform_3(%arg0: i32, %arg1: i32) -> (i32, i32) {
    %c0_i32 = arith.constant 0 : i32
    %c0_i32_0 = arith.constant 0 : i32
    return %arg0, %c0_i32 : i32, i32
  }
}

</mosaic_0001>

<bundles_post_ra>
// kernel: tpu_custom_call.1
= control target key start
LH: loop header
LB: loop body
LE: loop exit
PB: predicated region body
PF: predicated region fallthrough
CT: control target
= control target key end

     0   :  { %s616_s0 = inlined_call_operand.vmem [shape: f32[2,18,128], index: 0, kind: input, shape index: {}]   ;;  %s617_s1 = inlined_call_operand.vmem [shape: f32[1,128], index: 1, kind: input, shape index: {}]   ;;  %s618_s2 = inlined_call_operand.<no memory space> [shape: f32[1,1], index: 2, kind: input, shape index: {}]   ;;  %s619_s3 = inlined_call_operand.hbm [shape: f32[2,2], index: 3, kind: output, shape index: {}]  }
   0x1   :  { %8 = sst [smem:[#allocation3]] %s618_s2 }
   0x2   :  { %9 = vsyncpa [#allocation6], 0  ;;  %s520_s14 = smov 0   ;;  %s522_s15 = smov 0  }
   0x3   :  { %s524_s16 = smov 0   ;;  %s526_s17 = smov 0  }
   0x4   :  { %s528_s18 = smov 0  }
   0x5 LB: > { %s355_s2 = sadd.s32 4294967295, %s492_s18   ;;  %s24_s19 = sadd.s32 1, %s488_s17  ;;  %s492_s18 = sphi %s528_s18, %s15_s18   ;;  %s488_s17 = sphi %s526_s17, %s624_s17   ;;  %s484_s16 = sphi %s524_s16, %s623_s16   ;;  %s480_s15 = sphi %s522_s15, %s622_s15   ;;  %s476_s14 = sphi %s520_s14, %s621_s14  }
   0x6   : > { %p25_p0 = scmp.ge.s32.totalorder %s24_s19, 3  ;;  %p43_p1 = scmp.ne.s32.totalorder %s480_s15, %s476_s14 }
   0x7   : > { %p44_p2 = scmp.eq.s32.totalorder %s492_s18, 0  ;;  %s36_s21 = sadd.s32 1, %s480_s15 }
   0x8   : > { %s626_s19 = smov (%p25_p0, %s24_s19), 0  ;;  %p357_p5 = scmp.ge.s32.totalorder %s492_s18, 3 }
   0x9   : > { %p45_p3 = por %p44_p2, %p43_p1  ;;  %s32_s20 = ssub.s32 %s488_s17, %s626_s19 }
   0xa   : > { %p34_p4 = scmp.eq.s32.totalorder %s32_s20, 0  ;;  %143 = sbr.rel (%p357_p5) target bundleno = 24 (0x18), region = 24 }
   0xc   : > { %s556_s22 = scalar_select %p34_p4, %s480_s15, %s36_s21  }
  0x11   : > { %146 = sbr.rel (!%p45_p3) target bundleno = 24 (0x18), region = 28  ;;  %s148_s23 = sand.u32 (%p45_p3), 1, %s480_s15  }
  0x12   : > { %s359_s24 = sshll.u32 (%p45_p3), %s488_s17, 3  ;;  %s358_s25 = sshll.u32 (%p45_p3), %s148_s23, 4 }
  0x13   : > { %s155_s28 = scalar_lea.vmem (%p45_p3), %s616_s0, %s359_s24  ;;  %s150_s29 = scalar_lea.vmem (%p45_p3), [#allocation4], %s358_s25 }
  0x14   : > { %v185_v0 = vld [vmem:[%s155_s28] sm:$0xff] (%p45_p3)  ;;  %v187_v1 = vld [vmem:[%s155_s28 + $0x18] sm:$0xff] (%p45_p3) }
  0x15   : > { %186 = vst [vmem:[%s150_s29] sm:$0xff] (%p45_p3), %v185_v0  ;;  %188 = vst [vmem:[%s150_s29 + $0x8] sm:$0xff] (%p45_p3), %v187_v1 }
  0x18 PF: > { %p360_p6 = scmp.ge.s32.totalorder %s492_s18, 1  ;;  %p193_p7 = scmp.lt.s32.totalorder %s492_s18, 4 }
  0x1a   : > { %p194_p8 = pnand %p360_p6, %p193_p7 }
  0x1b   : > { %s200_s30 = sand.u32 (!%p194_p8), 1, %s476_s14   ;;  %p362_p9 = scmp.ne.s32.totalorder (!%p194_p8), %s484_s16, 0 }
  0x1c   : > { %197 = sbr.rel (%p194_p8) target bundleno = 275 (0x113), region = 66  ;;  %s361_s4 = sshll.u32 (!%p194_p8), %s200_s30, 4 }
  0x1d   : > { %s202_s5 = scalar_lea.vmem (!%p194_p8), [#allocation4], %s361_s4 }
  0x23   : > { %222 = sbr.rel (%p362_p9) target bundleno = 42 (0x2a), region = 74  ;;  %v494_v2 = vmov (!%p362_p9), 0.0  }
  0x24   : > { %223 = vst [vmem:[#allocation2] sm:$0x3] (!%p362_p9), %v494_v2 }
  0x2a PF: > { %s363_s6 = sshll.u32 %s484_s16, 3  ;;  %v227_v3 = vlaneseq  ;;  %v224_v6 = vld [vmem:[%s202_s5] sm:$0xff]  ;;  %v225_v7 = vld [vmem:[%s202_s5 + $0x8] sm:$0xff]  ;;  %vm249_vm1 = vcmask 1041409   ;;  %p364_p10 = scmp.ne.s32.totalorder %s484_s16, 2 }
  0x2b   : > { %v229_v4 = vstv %s363_s6  ;;  %v234_v21 = vld [vmem:[#allocation2] sm:$0x3]  ;;  %vm268_vm2 = vcmask (!%p364_p10), 1041408   ;;  %s272_s9 = sld [smem:[#allocation3]] (!%p364_p10)  ;;  %vm284_vm3 = vcmask (!%p364_p10), 7168   ;;  %vm286_vm5 = vcmask (!%p364_p10), 9216  }
  0x2c   : > { %v228_v5 = vshrl.u32 %v227_v3, 7  ;;  %v258_v26 = vld [vmem:[%s617_s1] sm:$0x1] (!%p364_p10)  ;;  %v495_v40 = vmov (!%p364_p10), 0.0  }
  0x2d   : > { %v259_v28 = vmul.f32 (!%p364_p10), 0.013888889, %v258_v26 }
  0x2e   : > { %v230_v8 = vadd.s32 %v229_v4, %v228_v5  ;;  %v264_v27 = vsub.s32 (!%p364_p10), 0, %v228_v5 }
  0x30   : > { %vm231_vm0 = vcmp.lt.s32.totalorder %v230_v8, 18  ;;  %v265_v30 = vrot.slane (!%p364_p10), %v259_v28, %v264_v27 }
  0x31   : > { %v232_v9 = vsel %vm231_vm0, %v224_v6, 0.0  ;;  %v233_v10 = vsel %vm231_vm0, %v225_v7, 0.0  ;;  %v273_v33 = vstv (!%p364_p10), %s272_s9 }
  0x32   : > { %v235_v11 = vrot.slane %v232_v9, 4  ;;  %v241_v12 = vrot.slane %v233_v10, 4 }
  0x34   : > { %v236_v13 = vadd.f32 %v235_v11, %v232_v9  ;;  %v242_v14 = vadd.f32 %v241_v12, %v233_v10 }
  0x36   : > { %v237_v15 = vrot.slane %v236_v13, 2  ;;  %v243_v16 = vrot.slane %v242_v14, 2 }
  0x38   : > { %v238_v17 = vadd.f32 %v237_v15, %v236_v13  ;;  %v244_v18 = vadd.f32 %v243_v16, %v242_v14 }
  0x3a   : > { %v239_v19 = vrot.slane %v238_v17, 1  ;;  %v245_v20 = vrot.slane %v244_v18, 1 }
  0x3b   : > { %257 = sbr.rel (%p364_p10) target bundleno = 250 (0xfa), region = 78 }
  0x3c   : > { %v240_v22 = vadd.f32 %v239_v19, %v238_v17  ;;  %v246_v23 = vadd.f32 %v245_v20, %v244_v18 }
  0x3e   : > { %v250_v24 = vsel %vm249_vm1, %v246_v23, %v240_v22 }
  0x3f   : > { %v252_v25 = vadd.f32 %v250_v24, %v234_v21 }
  0x41   : > { %253 = vst [vmem:[#allocation2] sm:$0x3] %v252_v25 }
  0x48   : > { %v260_v29 = vld [vmem:[#allocation2] sm:$0x3] }
  0x49   : > { %v267_v31 = vmul.f32 %v265_v30, %v260_v29 }
  0x4b   : > { %v269_v32 = vsel %vm268_vm2, %v267_v31, 0.0 }
  0x4c   : > { %270 = vadd.xlane.f32.xlu0 %v269_v32 }
  0xd9   : > { %v271_v34 = vpop.xlane.xlu0 %270 }
  0xda   : > { %v274_v35 = vadd.f32 %v273_v33, %v271_v34 }
  0xdc   : > { %v365_v36 = vmul.f32 -1.442695, %v274_v35 }
  0xde   : > { %420 = vpow2.f32 %v365_v36 }
  0xe8   : > { %v421_v37 = vpop.eup %420 }
  0xe9   : > { %v278_v38 = vadd.f32 1.0, %v421_v37 }
  0xeb   : > { %422 = vrcp.f32 %v278_v38 }
  0xf5   : > { %v423_v39 = vpop.eup %422 }
  0xf6   : > { %vm281_vm4 = vcmp.gt.f32.partialorder %v423_v39, 0.5 }
  0xf7   : > { %v366_v41 = vsel %vm281_vm4, 1.0, %v495_v40 }
  0xf8   : > { %v285_v42 = vsel %vm284_vm3, %v366_v41, %v423_v39 }
  0xf9   : > { %287 = vst.msk [vmem:[#allocation5] sm:$0x3] %vm286_vm5, %v285_v42 }
  0xfa PF: > { %p575_p11 = scmp.eq.s32.totalorder %s355_s2, 2  ;;  %s496_s11 = smov [#allocation5]  }
  0xfb   : > { %s297_s12 = sshll.u32 %s496_s11, 4  ;;  %s298_s12 = int_to_ptr.vmem [resolvable:$true] %s297_s12 }
  0xfc   : > { %s424_s13 = scalar_lea.vmem %s298_s12, 32  ;;  %p431_p1 = scmp.lt.s32.totalorder %s298_s12, %s298_s12 }
  0xfd   : > { %p425_p12 = scmp.ne.s32.totalorder %s298_s12, %s424_s13  ;;  %p432_p2 = scmp.lt.s32.totalorder %s424_s13, %s424_s13 }
  0xff   : > { %p426_p13 = pnand %p425_p12, %p575_p11  ;;  %p433_p3 = por %p432_p2, %p431_p1 }
 0x101   : > { %p427_p0 = pneg %p426_p13 }
 0x103   : > { %p434_p4 = pnand %p433_p3, %p427_p0 }
 0x105   : > { %437 = shalt.err (!%p434_p4)
}
 0x106   : > { %s438_s2 = scalar_lea.hbm %s619_s3, 32 }
 0x107   : > { %p439_p5 = scmp.ne.s32.totalorder %s619_s3, %s438_s2  ;;  %p444_p8 = scmp.lt.u32.totalorder %s438_s2, %s619_s3 }
 0x109   : > { %p440_p6 = pnand %p439_p5, %p575_p11 }
 0x10b   : > { %p441_p7 = pneg %p440_p6 }
 0x10d   : > { %p446_p9 = pnand %p444_p8, %p441_p7 }
 0x10f   : > { %449 = shalt.err (!%p446_p9)
}
 0x110   : > { %372 = dma.vmem_to_hbm [thread:$0]  (%p575_p11), %s298_s12, 32, %s619_s3, [#allocation6]  }
 0x111   : > { %471 = dma.done.wait (%p575_p11), [#allocation6], 32  }
 0x112   : > { %473 = vsyncadd (%p575_p11), [#allocation6], 4294967264 }
 0x113 PF: > { %s15_s18 = sadd.s32 1, %s492_s18   ;;  %s621_s14 = smov %s480_s15 }
 0x114   : > { %p12_p10 = scmp.ge.s32.totalorder %s15_s18, 5   ;;  %s622_s15 = smov %s556_s22 }
 0x115   : > { %s623_s16 = smov %s488_s17  ;;  %s624_s17 = smov %s626_s19 }
 0x116   :  { %14 = sbr.rel (!%p12_p10) target bundleno = 5 (0x5), region = 111 }
 0x11d   :  { %310 = vsyncpa [#allocation6], 1 }
 0x11e   :  { %312 = vsyncpa [#allocation6 + $0x1], 1 }

</bundles_post_ra>
